<compile_context>
chip_gen: v6e
topology: v6e:2x2x1
jax: 0.10.0
libtpu: 0.0.40
codegen_flags: <defaults>
</compile_context>

<pallas_src>
import jax
import jax.numpy as jnp
from jax.experimental import pallas as pl
from jax.experimental.pallas import tpu as pltpu

# Module hyperparameters (small, consistent with the forward pass).
N_CHANNELS = 4
CENTRAL_RANGE = 16
D_OUT = N_CHANNELS * CENTRAL_RANGE        # 64
D_FUSED = 2 * D_OUT                       # 128 -> exactly one lane-dense vreg width
D_LATENT = 8
HIDDEN = 32
BATCH = 2


def _decoder_mlp_kernel(z_ref, w1_ref, b1_ref, w2_ref, b2_ref, out_ref):
    # z @ W1 -> (+b1, ReLU) -> @ W2 -> +b2, fused; one 128-lane unmasked store.
    # MXU operands in bf16, accumulation + elementwise epilogue in f32.
    z = z_ref[...].astype(jnp.bfloat16)                               # (tb, d_latent)
    w1 = w1_ref[...].astype(jnp.bfloat16)
    h = jnp.dot(z, w1, preferred_element_type=jnp.float32)            # (tb, hidden) f32
    h = jnp.maximum(h + b1_ref[...], 0.0)                             # bias + ReLU (f32 VPU)

    w2 = w2_ref[...].astype(jnp.bfloat16)
    out = jnp.dot(h.astype(jnp.bfloat16), w2,
                  preferred_element_type=jnp.float32)                 # (tb, 128) f32
    out_ref[...] = out + b2_ref[...]                                  # lane-dense store


def decoder_forward(z, w1, b1, w2, b2, *, max_tile_b=256):
    """Runs the decoder MLP in a Pallas kernel and returns (mean, scale),
    each shaped (B, 1, N_CHANNELS, CENTRAL_RANGE) — the Normal parameters."""
    # z.view(B, -1)
    z2d = z.reshape(z.shape[0], -1).astype(jnp.float32)
    B = z2d.shape[0]

    # Batch tile: multiple of 8 sublanes; small batches collapse to one step,
    # large batches stream over a parallel grid with resident weights.
    tile_b = min(max_tile_b, max(8, ((B + 7) // 8) * 8))
    B_pad = ((B + tile_b - 1) // tile_b) * tile_b
    if B_pad != B:
        z2d = jnp.pad(z2d, ((0, B_pad - B), (0, 0)))

    grid = (B_pad // tile_b,)

    flops = 2 * B_pad * (D_LATENT * HIDDEN + HIDDEN * D_FUSED)
    bytes_accessed = 4 * (B_pad * D_LATENT + B_pad * D_FUSED
                          + D_LATENT * HIDDEN + HIDDEN
                          + HIDDEN * D_FUSED + D_FUSED)
    cost = pl.CostEstimate(flops=flops, transcendentals=0,
                           bytes_accessed=bytes_accessed)

    out = pl.pallas_call(
        _decoder_mlp_kernel,
        out_shape=jax.ShapeDtypeStruct((B_pad, D_FUSED), jnp.float32),
        grid=grid,
        in_specs=[
            pl.BlockSpec((tile_b, D_LATENT), lambda i: (i, 0)),   # z: streamed per tile
            pl.BlockSpec((D_LATENT, HIDDEN), lambda i: (0, 0)),   # w1: resident
            pl.BlockSpec((1, HIDDEN), lambda i: (0, 0)),          # b1: resident
            pl.BlockSpec((HIDDEN, D_FUSED), lambda i: (0, 0)),    # w2: resident
            pl.BlockSpec((1, D_FUSED), lambda i: (0, 0)),         # b2: resident
        ],
        out_specs=pl.BlockSpec((tile_b, D_FUSED), lambda i: (i, 0)),
        compiler_params=pltpu.CompilerParams(
            dimension_semantics=("parallel",)),
        cost_estimate=cost,
    )(z2d, w1, b1, w2, b2)

    out = out[:B]
    # Split + exp in plain JAX (keeps the kernel store lane-dense; exp in f32).
    mean = out[:, :D_OUT].reshape(-1, 1, N_CHANNELS, CENTRAL_RANGE)
    scale = jnp.exp(out[:, D_OUT:]).reshape(-1, 1, N_CHANNELS, CENTRAL_RANGE)
    return mean, scale


def init_params(key):
    """Deterministic parameter init (shapes follow the decoder MLP)."""
    k1, k2, k3, k4 = jax.random.split(key, 4)
    w1 = jax.random.normal(k1, (D_LATENT, HIDDEN), jnp.float32) * 0.1
    b1 = jax.random.normal(k2, (1, HIDDEN), jnp.float32) * 0.01
    w2 = jax.random.normal(k3, (HIDDEN, D_FUSED), jnp.float32) * 0.1
    b2 = jax.random.normal(k4, (1, D_FUSED), jnp.float32) * 0.01
    return w1, b1, w2, b2


if __name__ == "__main__":
    key = jax.random.PRNGKey(0)
    kz, kp = jax.random.split(key)
    # latent input; any trailing shape is flattened by z.view(B, -1)
    z = jax.random.normal(kz, (BATCH, D_LATENT), jnp.float32)
    w1, b1, w2, b2 = init_params(kp)

    mean, scale = decoder_forward(z, w1, b1, w2, b2)
    jax.block_until_ready((mean, scale))

    assert mean.shape == (BATCH, 1, N_CHANNELS, CENTRAL_RANGE)
    assert scale.shape == (BATCH, 1, N_CHANNELS, CENTRAL_RANGE)
    assert bool(jnp.all(scale > 0.0))

    # Pure-JAX f32 reference; tolerance loosened for bf16 matmul operands.
    h_ref = jnp.maximum(z @ w1 + b1, 0.0) @ w2 + b2
    mean_ref = h_ref[:, :D_OUT].reshape(-1, 1, N_CHANNELS, CENTRAL_RANGE)
    scale_ref = jnp.exp(h_ref[:, D_OUT:]).reshape(-1, 1, N_CHANNELS, CENTRAL_RANGE)
    assert jnp.allclose(mean, mean_ref, atol=2e-2, rtol=2e-2)
    assert jnp.allclose(scale, scale_ref, atol=2e-2, rtol=2e-2)

    print("KERNEL_OK")
</pallas_src>

<mosaic_0001>
module attributes {stable_mosaic.version = 11 : i64} {
  func.func @_decoder_mlp_kernel(%arg0: i32, %arg1: memref<8x8xf32, #tpu.memory_space<vmem>>, %arg2: memref<8x32xf32, #tpu.memory_space<vmem>>, %arg3: memref<1x32xf32, #tpu.memory_space<vmem>>, %arg4: memref<32x128xf32, #tpu.memory_space<vmem>>, %arg5: memref<1x128xf32, #tpu.memory_space<vmem>>, %arg6: memref<8x128xf32, #tpu.memory_space<vmem>>) attributes {dimension_semantics = [#tpu.dimension_semantics<parallel>], iteration_bounds = array<i64: 1>, scalar_prefetch = 0 : i64, scratch_operands = 0 : i64, tpu.core_type = #tpu.core_type<tc>, window_params = [{transform_indices = @transform_0, window_bounds = array<i64: 8, 8>}, {pipeline_mode = #tpu.pipeline_mode<synchronous>, transform_indices = @transform_1, window_bounds = array<i64: 8, 32>}, {pipeline_mode = #tpu.pipeline_mode<synchronous>, transform_indices = @transform_2, window_bounds = array<i64: 1, 32>}, {pipeline_mode = #tpu.pipeline_mode<synchronous>, transform_indices = @transform_3, window_bounds = array<i64: 32, 128>}, {pipeline_mode = #tpu.pipeline_mode<synchronous>, transform_indices = @transform_4, window_bounds = array<i64: 1, 128>}, {transform_indices = @transform_5, window_bounds = array<i64: 8, 128>}]} {
    %c0 = arith.constant 0 : index
    %c0_0 = arith.constant 0 : index
    %0 = vector.load %arg1[%c0, %c0_0] : memref<8x8xf32, #tpu.memory_space<vmem>>, vector<8x8xf32>
    %1 = arith.truncf %0 : vector<8x8xf32> to vector<8x8xbf16>
    %c0_1 = arith.constant 0 : index
    %c0_2 = arith.constant 0 : index
    %2 = vector.load %arg2[%c0_1, %c0_2] : memref<8x32xf32, #tpu.memory_space<vmem>>, vector<8x32xf32>
    %3 = arith.truncf %2 : vector<8x32xf32> to vector<8x32xbf16>
    %cst = arith.constant dense<0.000000e+00> : vector<8x32xf32>
    %4 = tpu.matmul %1, %3, %cst {dimension_numbers = #tpu.dot_dimension_numbers<[1], [0], [0], [1], [0, 0, 1, 1], [], []>} : vector<8x8xbf16>, vector<8x32xbf16>, vector<8x32xf32> -> vector<8x32xf32>
    %c0_3 = arith.constant 0 : index
    %c0_4 = arith.constant 0 : index
    %5 = vector.load %arg3[%c0_3, %c0_4] : memref<1x32xf32, #tpu.memory_space<vmem>>, vector<1x32xf32>
    %6 = vector.broadcast %5 : vector<1x32xf32> to vector<8x32xf32>
    %7 = arith.addf %4, %6 : vector<8x32xf32>
    %cst_5 = arith.constant 0.000000e+00 : f32
    %8 = vector.broadcast %cst_5 : f32 to vector<8x32xf32>
    %9 = arith.maximumf %7, %8 : vector<8x32xf32>
    %c0_6 = arith.constant 0 : index
    %c0_7 = arith.constant 0 : index
    %10 = vector.load %arg4[%c0_6, %c0_7] : memref<32x128xf32, #tpu.memory_space<vmem>>, vector<32x128xf32>
    %11 = arith.truncf %10 : vector<32x128xf32> to vector<32x128xbf16>
    %12 = arith.truncf %9 : vector<8x32xf32> to vector<8x32xbf16>
    %cst_8 = arith.constant dense<0.000000e+00> : vector<8x128xf32>
    %13 = tpu.matmul %12, %11, %cst_8 {dimension_numbers = #tpu.dot_dimension_numbers<[1], [0], [0], [1], [0, 0, 1, 1], [], []>} : vector<8x32xbf16>, vector<32x128xbf16>, vector<8x128xf32> -> vector<8x128xf32>
    %c0_9 = arith.constant 0 : index
    %c0_10 = arith.constant 0 : index
    %14 = vector.load %arg5[%c0_9, %c0_10] : memref<1x128xf32, #tpu.memory_space<vmem>>, vector<1x128xf32>
    %15 = vector.broadcast %14 : vector<1x128xf32> to vector<8x128xf32>
    %16 = arith.addf %13, %15 : vector<8x128xf32>
    %c0_11 = arith.constant 0 : index
    %c0_12 = arith.constant 0 : index
    %17 = vector.load %arg6[%c0_11, %c0_12] : memref<8x128xf32, #tpu.memory_space<vmem>>, vector<8x128xf32>
    tpu.vector_store %arg6[%c0_11, %c0_12], %16 {strides = array<i32>} : memref<8x128xf32, #tpu.memory_space<vmem>>, vector<8x128xf32>,
    return
  }
  func.func @transform_0(%arg0: i32) -> (i32, i32) {
    %c0_i32 = arith.constant 0 : i32
    %c0_i32_0 = arith.constant 0 : i32
    return %arg0, %c0_i32 : i32, i32
  }
  func.func @transform_1(%arg0: i32) -> (i32, i32) {
    %c0_i32 = arith.constant 0 : i32
    %c0_i32_0 = arith.constant 0 : i32
    %c0_i32_1 = arith.constant 0 : i32
    return %c0_i32, %c0_i32_0 : i32, i32
  }
  func.func @transform_2(%arg0: i32) -> (i32, i32) {
    %c0_i32 = arith.constant 0 : i32
    %c0_i32_0 = arith.constant 0 : i32
    %c0_i32_1 = arith.constant 0 : i32
    return %c0_i32, %c0_i32_0 : i32, i32
  }
  func.func @transform_3(%arg0: i32) -> (i32, i32) {
    %c0_i32 = arith.constant 0 : i32
    %c0_i32_0 = arith.constant 0 : i32
    %c0_i32_1 = arith.constant 0 : i32
    return %c0_i32, %c0_i32_0 : i32, i32
  }
  func.func @transform_4(%arg0: i32) -> (i32, i32) {
    %c0_i32 = arith.constant 0 : i32
    %c0_i32_0 = arith.constant 0 : i32
    %c0_i32_1 = arith.constant 0 : i32
    return %c0_i32, %c0_i32_0 : i32, i32
  }
  func.func @transform_5(%arg0: i32) -> (i32, i32) {
    %c0_i32 = arith.constant 0 : i32
    %c0_i32_0 = arith.constant 0 : i32
    return %arg0, %c0_i32 : i32, i32
  }
}

</mosaic_0001>

<bundles_post_ra>
// kernel: tpu_custom_call.1
= control target key start
LH: loop header
LB: loop body
LE: loop exit
PB: predicated region body
PF: predicated region fallthrough
CT: control target
= control target key end

     0   :  { %10 = vsyncpa [#allocation3], 0  ;;  %s367_s0 = inlined_call_operand.hbm [shape: f32[8,8], index: 0, kind: input, shape index: {}]   ;;  %s368_s1 = inlined_call_operand.hbm [shape: f32[8,32], index: 1, kind: input, shape index: {}]   ;;  %s369_s2 = inlined_call_operand.vmem [shape: f32[1,32], index: 2, kind: input, shape index: {}]   ;;  %s370_s3 = inlined_call_operand.hbm [shape: f32[32,128], index: 3, kind: input, shape index: {}]   ;;  %s371_s4 = inlined_call_operand.vmem [shape: f32[1,128], index: 4, kind: input, shape index: {}]   ;;  %s372_s5 = inlined_call_operand.hbm [shape: f32[8,128], index: 5, kind: output, shape index: {}]  }
   0x1   :  { %11 = vsyncpa [#allocation6], 0 }
   0x2   :  { %12 = vsyncpa [#allocation4], 0  ;;  %s311_s18 = smov [#allocation5]   ;;  %s312_s20 = smov [#allocation2]  }
   0x3   :  { %s29_s19 = sshll.u32 %s311_s18, 4  ;;  %s19_s21 = sshll.u32 %s312_s20, 4  ;;  %s30_s19 = int_to_ptr.vmem [resolvable:$true] %s29_s19  ;;  %s20_s21 = int_to_ptr.vmem [resolvable:$true] %s19_s21 }
   0x4   :  { %s233_s22 = scalar_lea.vmem %s30_s19, 128  ;;  %p238_p1 = scmp.lt.s32.totalorder %s30_s19, %s30_s19 }
   0x5   :  { %p234_p0 = scmp.ne.s32.totalorder %s30_s19, %s233_s22  ;;  %p239_p2 = scmp.lt.s32.totalorder %s233_s22, %s233_s22 }
   0x7   :  { %p240_p3 = por %p239_p2, %p238_p1 }
   0x9   :  { %p241_p4 = pnand %p240_p3, %p234_p0 }
   0xb   :  { %244 = shalt.err (!%p241_p4)
}
   0xc   :  { %32 = dma.hbm_to_vmem [thread:$0]  %s368_s1, 128, %s30_s19, [#allocation6]  }
   0xd   :  { %s253_s25 = scalar_lea.vmem %s20_s21, 128  ;;  %p258_p6 = scmp.lt.s32.totalorder %s20_s21, %s20_s21 }
   0xe   :  { %p254_p5 = scmp.ne.s32.totalorder %s20_s21, %s253_s25  ;;  %p259_p7 = scmp.lt.s32.totalorder %s253_s25, %s253_s25 }
  0x10   :  { %p260_p8 = por %p259_p7, %p258_p6 }
  0x12   :  { %p261_p9 = pnand %p260_p8, %p254_p5 }
  0x14   :  { %264 = shalt.err (!%p261_p9)
}
  0x15   :  { %22 = dma.hbm_to_vmem [thread:$0]  %s367_s0, 128, %s20_s21, [#allocation3]  }
  0x16   :  { %s313_s28 = smov [#allocation7]  }
  0x17   :  { %s40_s29 = sshll.u32 %s313_s28, 4  ;;  %s41_s29 = int_to_ptr.vmem [resolvable:$true] %s40_s29 }
  0x18   :  { %s273_s30 = scalar_lea.vmem %s41_s29, 512  ;;  %p278_p11 = scmp.lt.s32.totalorder %s41_s29, %s41_s29 }
  0x19   :  { %p274_p10 = scmp.ne.s32.totalorder %s41_s29, %s273_s30  ;;  %p279_p12 = scmp.lt.s32.totalorder %s273_s30, %s273_s30 }
  0x1b   :  { %p280_p13 = por %p279_p12, %p278_p11 }
  0x1d   :  { %p281_p0 = pnand %p280_p13, %p274_p10 }
  0x1f   :  { %284 = shalt.err (!%p281_p0)
}
  0x20   :  { %s314_s1 = smov 128   ;;  %s315_s6 = smov 8  }
  0x21   :  { %46 = dma.hbm_to_vmem [thread:$0]  %s370_s3, 512, %s41_s29, [#allocation6], %s314_s1, %s314_s1, %s315_s6  }
  0x22   :  { %305 = dma.done.wait [#allocation3], 128  }
  0x23   :  { %306 = vsyncadd [#allocation3], 4294967168 }
  0x24   :  { %307 = dma.done.wait [#allocation6], 640  }
  0x25   :  { %308 = vsyncadd [#allocation6], 4294966656  ;;  %v316_v0 = vmov 0.0   ;;  %vm317_vm0 = vmmov 0   ;;  %v61_v1 = vld [vmem:[#allocation5] sm:$0xff]  ;;  %vm74_vm1 = vcmask 1043456  }
  0x26   :  { %203 = vmatprep.subr.bf16.mxu0 %v316_v0  ;;  %205 = vmatprep.mubr.msk.bf16.mxu0 %vm317_vm0, %v316_v0  ;;  %v59_v2 = vld [vmem:[#allocation2] sm:$0xff]  ;;  %v62_v3 = vpack.c.bf16 %v61_v1, %v61_v1  ;;  %vm70_vm2 = vcmask 64512   ;;  %v122_v7 = vld [vmem:[#allocation7 + $0x18] sm:$0xff]  ;;  %v119_v9 = vld [vmem:[#allocation7] sm:$0xff]  ;;  %vm133_vm3 = vcmask 261120   ;;  %s318_s11 = smov [#allocation8]  }
  0x27   :  { %209 = vmatprep.subr.bf16.mxu1 %v316_v0  ;;  %213 = vmatprep.mubr.msk.bf16.mxu1 %vm317_vm0, %v316_v0  ;;  %v60_v5 = vpack.c.bf16 %v59_v2, %v59_v2  ;;  %v121_v6 = vld [vmem:[#allocation7 + $0x10] sm:$0xff]  ;;  %v120_v10 = vld [vmem:[#allocation7 + $0x8] sm:$0xff]  ;;  %s184_s12 = sshll.u32 %s318_s11, 4  ;;  %s185_s12 = int_to_ptr.vmem [resolvable:$true] %s184_s12 }
  0x28   :  { %v76_v4 = vsel %vm74_vm1, %v62_v3, 0  ;;  %v124_v8 = vpack.c.bf16 %v122_v7, %v121_v6  ;;  %v123_v11 = vpack.c.bf16 %v120_v10, %v119_v9  ;;  %v194_v12 = vld [vmem:[%s369_s2] ss:$0 sm:$0xff]  ;;  %s285_s2 = scalar_lea.vmem %s185_s12, 128  ;;  %p290_p2 = scmp.lt.s32.totalorder %s185_s12, %s185_s12 }
  0x29   :  { %204 = vmatpush3.bf16.msra.mxu0 %v76_v4  ;;  %v196_v20 = vld [vmem:[%s371_s4] ss:$0 sm:$0xff]  ;;  %p286_p1 = scmp.ne.s32.totalorder %s185_s12, %s285_s2  ;;  %p291_p3 = scmp.lt.s32.totalorder %s285_s2, %s285_s2 }
  0x2a   :  { %210 = vmatpush3.bf16.msra.mxu1 %v124_v8 }
  0x2b   :  { %211 = vmatprep.subr.bf16.mxu1 %v316_v0  ;;  %p292_p4 = por %p291_p3, %p290_p2 }
  0x2c   :  { %206 = vmatmul.mubr.msk.bf16.vlgmr.msra.gmra.mxu0 %vm70_vm2, %v60_v5 }
  0x2d   :  { %p293_p5 = pnand %p292_p4, %p286_p1 }
  0x2e   :  { %212 = vmatpush3.bf16.msra.mxu1 %v123_v11 }
  0xec   :  { %v112_v13 = vpop.f32.mrf.mxu0 }
  0xed   :  { %v113_v14 = vadd.f32 %v194_v12, %v112_v13 }
  0xee   :  { %v207_v15 = vpop.f32.mrf.mxu0 }
  0xef   :  { %v118_v16 = vmax.f32 %v113_v14, 0.0 }
  0xf0   :  { %v115_v17 = vpop.f32.mrf.mxu0 }
  0xf1   :  { %v125_v18 = vpack.c.bf16 %v118_v16, %v118_v16 }
  0xf2   :  { %v208_v19 = vpop.f32.mrf.mxu0 }
  0xf3   :  { %214 = vmatmul.mubr.msk.bf16.vlgmr.msra.gmra.mxu1 %vm133_vm3, %v125_v18 }
 0x1b3   :  { %v171_v21 = vpop.f32.mrf.mxu1 }
 0x1b4   :  { %v172_v22 = vadd.f32 %v196_v20, %v171_v21 }
 0x1b5   :  { %v215_v23 = vpop.f32.mrf.mxu1 }
 0x1b6   :  { %177 = vst [vmem:[#allocation8] sm:$0xff] %v172_v22 }
 0x1b7   :  { %v174_v24 = vpop.f32.mrf.mxu1 }
 0x1b8   :  { %296 = shalt.err (!%p293_p5)
}
 0x1b9   :  { %187 = dma.vmem_to_hbm [thread:$0]  %s185_s12, 128, %s372_s5, [#allocation4]   ;;  %v216_v25 = vpop.f32.mrf.mxu1 }
 0x1ba   :  { %309 = dma.done.wait [#allocation4], 128  }
 0x1bb   :  { %310 = vsyncadd [#allocation4], 4294967168 }
 0x1bc   :  { %191 = vsyncpa [#allocation3], 1 }
 0x1bd   :  { %192 = vsyncpa [#allocation6], 1 }
 0x1be   :  { %193 = vsyncpa [#allocation4], 1 }

</bundles_post_ra>
